<compile_context>
chip_gen: v5e
topology: v5e:2x2
jax: 0.10.0
libtpu: 0.0.40
codegen_flags: <defaults>
</compile_context>

<pallas_src>
import jax
import jax.numpy as jnp
from jax.experimental import pallas as pl
from jax.experimental.pallas import tpu as pltpu


def _make_se_kernel(nb):
    """Kernel over a (nb, C_in, TS) activation block."""
    def kernel(x_ref, w1_ref, b1_ref, w2_ref, b2_ref, o_ref):
        # x_ref/o_ref: (nb, C_in, TS)  channels on sublanes, spatial on lanes
        # w1_ref: (C_mid, C_in), b1_ref: (C_mid, 1)  (BN1 folded)
        # w2_ref: (C_in, C_mid), b2_ref: (C_in, 1)   (BN2 folded)
        w1 = w1_ref[...]
        b1 = b1_ref[...]
        w2 = w2_ref[...]
        b2 = b2_ref[...]
        for b in range(nb):                      # nb is small & static -> unrolled
            x = x_ref[b]                         # (C_in, TS), native dtype
            # fc1 (= 1x1 conv folded with BN1) then ReLU
            h = jnp.dot(w1, x, preferred_element_type=jnp.float32) + b1
            h = jnp.maximum(h, 0.0)
            # fc2 (= 1x1 conv folded with BN2) then sigmoid
            y = jnp.dot(w2, h.astype(w2.dtype),
                        preferred_element_type=jnp.float32) + b2
            # sigmoid: exp on the EUP; approx reciprocal also uses the EUP slot
            gate = pl.reciprocal(1.0 + jnp.exp(-y), approx=True)
            # downcast the small gate instead of upcasting the activation tile
            o_ref[b] = (x * gate.astype(x.dtype)).astype(o_ref.dtype)
    return kernel


def _vmem_budgets():
    """Return (io_budget_bytes, vmem_limit_bytes) per TPU generation."""
    try:
        cap = pltpu.get_tpu_info().vmem_capacity_bytes
    except Exception:
        cap = 64 * 1024 * 1024            # unknown -> be conservative (v7x-sized)
    if cap >= 96 * 1024 * 1024:           # v5e / v6e: 128 MiB physical VMEM
        return 24 * 1024 * 1024, 64 * 1024 * 1024
    else:                                 # v7x: 64 MiB physical VMEM
        return 12 * 1024 * 1024, 32 * 1024 * 1024


def _choose_tiles(N, C_in, C_mid, S, itemsize, io_budget,
                  target_block_bytes=1 << 20, max_nb=8):
    """Pick (nb, ts): batches per block and spatial lanes per block."""
    # Per lane column: double-buffered input + output tiles (native dtype) plus
    # single-buffered f32 intermediates (h: C_mid rows, y/gate: C_in rows).
    bytes_per_col = 4 * C_in * itemsize + 4 * (C_in + C_mid)

    # Spatial tile: multiple of 128 lanes (or the full dim when S <= 128).
    if S <= 128:
        ts = S                            # full-dim block (exempt from 128 rule)
    else:
        cap = max(128, (io_budget // bytes_per_col) // 128 * 128)
        if S % 128 == 0:
            ts = min(S, cap)
            while S % ts != 0:            # prefer uniform blocks when cheap
                ts -= 128
        else:
            # capped multiple of 128; cdiv grid + masked stores handle the tail
            ts = min(cap, (S // 128) * 128)

    # Batch blocking: grow the block until DMA granules approach ~1 MiB.
    nb = 1
    block_bytes = C_in * ts * itemsize
    col_bytes = ts * bytes_per_col
    while (nb < min(N, max_nb)
           and nb * block_bytes < target_block_bytes
           and 2 * nb * col_bytes <= io_budget):
        nb *= 2
    nb = min(nb, N)

    # Keep >= 2 total grid steps so v7x's second TensorCore isn't idle.
    def n_steps(nb_, ts_):
        return pl.cdiv(N, nb_) * pl.cdiv(S, ts_)
    while nb > 1 and n_steps(nb, ts) < 2:
        nb //= 2
    if n_steps(nb, ts) < 2 and ts > 128:
        ts = pl.cdiv(ts // 2, 128) * 128
    return nb, ts


def my_se_block(x_nchw,
                w1, bn1_gamma, bn1_beta, bn1_mean, bn1_var,
                w2, bn2_gamma, bn2_beta, bn2_mean, bn2_var,
                *, eps=1e-5):
    """x_nchw: (N, C_in, H, W). w1: (C_mid, C_in, 1, 1). w2: (C_in, C_mid, 1, 1)."""
    N, C_in, H, W = x_nchw.shape
    C_mid = w1.shape[0]
    S = H * W

    # Feed the MXU in bf16 when the activations are bf16; otherwise stay f32.
    compute_dtype = jnp.bfloat16 if x_nchw.dtype == jnp.bfloat16 else jnp.float32

    # Fold eval-mode BN into the (bias-free) 1x1 convs.
    s1 = bn1_gamma / jnp.sqrt(bn1_var + eps)                              # (C_mid,)
    w1_eff = (w1[:, :, 0, 0] * s1[:, None]).astype(compute_dtype)         # (C_mid, C_in)
    b1_eff = (bn1_beta - bn1_mean * s1).reshape(C_mid, 1).astype(jnp.float32)

    s2 = bn2_gamma / jnp.sqrt(bn2_var + eps)                              # (C_in,)
    w2_eff = (w2[:, :, 0, 0] * s2[:, None]).astype(compute_dtype)         # (C_in, C_mid)
    b2_eff = (bn2_beta - bn2_mean * s2).reshape(C_in, 1).astype(jnp.float32)

    # NCHW -> (N, C, H*W): metadata-only reshape, no transpose, no copy.
    x_flat = x_nchw.reshape(N, C_in, S)

    io_budget, vmem_limit = _vmem_budgets()
    itemsize = int(jnp.dtype(x_nchw.dtype).itemsize)     # real itemsize (bf16 = 2)
    nb, ts = _choose_tiles(N, C_in, C_mid, S, itemsize, io_budget)
    grid = (pl.cdiv(N, nb), pl.cdiv(S, ts))

    out_flat = pl.pallas_call(
        _make_se_kernel(nb),
        out_shape=jax.ShapeDtypeStruct((N, C_in, S), x_nchw.dtype),
        grid_spec=pltpu.PrefetchScalarGridSpec(
            num_scalar_prefetch=0,
            grid=grid,
            in_specs=[
                pl.BlockSpec((nb, C_in, ts), lambda n, s: (n, 0, s)),   # x
                pl.BlockSpec((C_mid, C_in), lambda n, s: (0, 0)),       # w1 (BN1 folded)
                pl.BlockSpec((C_mid, 1), lambda n, s: (0, 0)),          # b1
                pl.BlockSpec((C_in, C_mid), lambda n, s: (0, 0)),       # w2 (BN2 folded)
                pl.BlockSpec((C_in, 1), lambda n, s: (0, 0)),           # b2
            ],
            out_specs=pl.BlockSpec((nb, C_in, ts), lambda n, s: (n, 0, s)),
        ),
        compiler_params=pltpu.CompilerParams(
            dimension_semantics=("parallel", "parallel"),
            vmem_limit_bytes=vmem_limit),
        # TODO(synk): pass input_output_aliases={0: 0} when the caller can donate
        # x (memory-footprint win only; HBM traffic is unchanged).
    )(x_flat, w1_eff, b1_eff, w2_eff, b2_eff)

    return out_flat.reshape(N, C_in, H, W)


def _reference(x, w1, g1, b1, m1, v1, w2, g2, b2, m2, v2, eps=1e-5):
    # Pure-JAX reference of the same (eval-mode BN) forward.
    hp = jax.lax.Precision.HIGHEST
    h = jnp.einsum("nchw,mc->nmhw", x, w1[:, :, 0, 0], precision=hp)
    h = (h - m1[None, :, None, None]) / jnp.sqrt(v1 + eps)[None, :, None, None] \
        * g1[None, :, None, None] + b1[None, :, None, None]
    h = jnp.maximum(h, 0.0)
    y = jnp.einsum("nmhw,cm->nchw", h, w2[:, :, 0, 0], precision=hp)
    y = (y - m2[None, :, None, None]) / jnp.sqrt(v2 + eps)[None, :, None, None] \
        * g2[None, :, None, None] + b2[None, :, None, None]
    y = jax.nn.sigmoid(y)
    return x * y


if __name__ == "__main__":
    key = jax.random.PRNGKey(0)
    ks = jax.random.split(key, 11)

    # Small shapes consistent with the module: ch_in // reduction must be >= 1.
    N, ch_in, H, W = 2, 32, 16, 16
    reduction = 4
    c_mid = ch_in // reduction  # 8

    x = jax.random.normal(ks[0], (N, ch_in, H, W), dtype=jnp.float32)

    w1 = jax.random.normal(ks[1], (c_mid, ch_in, 1, 1), dtype=jnp.float32) * 0.1
    g1 = 1.0 + 0.1 * jax.random.normal(ks[2], (c_mid,), dtype=jnp.float32)
    b1 = 0.1 * jax.random.normal(ks[3], (c_mid,), dtype=jnp.float32)
    m1 = 0.1 * jax.random.normal(ks[4], (c_mid,), dtype=jnp.float32)
    v1 = jnp.abs(1.0 + 0.1 * jax.random.normal(ks[5], (c_mid,), dtype=jnp.float32))

    w2 = jax.random.normal(ks[6], (ch_in, c_mid, 1, 1), dtype=jnp.float32) * 0.1
    g2 = 1.0 + 0.1 * jax.random.normal(ks[7], (ch_in,), dtype=jnp.float32)
    b2 = 0.1 * jax.random.normal(ks[8], (ch_in,), dtype=jnp.float32)
    m2 = 0.1 * jax.random.normal(ks[9], (ch_in,), dtype=jnp.float32)
    v2 = jnp.abs(1.0 + 0.1 * jax.random.normal(ks[10], (ch_in,), dtype=jnp.float32))

    out = my_se_block(x, w1, g1, b1, m1, v1, w2, g2, b2, m2, v2)
    out = jax.block_until_ready(out)

    ref = _reference(x, w1, g1, b1, m1, v1, w2, g2, b2, m2, v2)
    assert out.shape == (N, ch_in, H, W)
    # Tolerance accounts for the approximate EUP reciprocal in the sigmoid.
    assert jnp.allclose(out, ref, atol=5e-3, rtol=5e-3), "mismatch vs reference"

    print("KERNEL_OK")
</pallas_src>

<mosaic_0001>
module attributes {stable_mosaic.version = 11 : i64} {
  func.func @kernel(%arg0: i32, %arg1: i32, %arg2: memref<1x32x256xf32, #tpu.memory_space<vmem>>, %arg3: memref<8x32xf32, #tpu.memory_space<vmem>>, %arg4: memref<8x1xf32, #tpu.memory_space<vmem>>, %arg5: memref<32x8xf32, #tpu.memory_space<vmem>>, %arg6: memref<32x1xf32, #tpu.memory_space<vmem>>, %arg7: memref<1x32x256xf32, #tpu.memory_space<vmem>>) attributes {dimension_semantics = [#tpu.dimension_semantics<parallel>, #tpu.dimension_semantics<parallel>], iteration_bounds = array<i64: 2, 1>, scalar_prefetch = 0 : i64, scratch_operands = 0 : i64, tpu.core_type = #tpu.core_type<tc>, window_params = [{transform_indices = @transform_0, window_bounds = array<i64: 1, 32, 256>}, {pipeline_mode = #tpu.pipeline_mode<synchronous>, transform_indices = @transform_1, window_bounds = array<i64: 8, 32>}, {pipeline_mode = #tpu.pipeline_mode<synchronous>, transform_indices = @transform_2, window_bounds = array<i64: 8, 1>}, {pipeline_mode = #tpu.pipeline_mode<synchronous>, transform_indices = @transform_3, window_bounds = array<i64: 32, 8>}, {pipeline_mode = #tpu.pipeline_mode<synchronous>, transform_indices = @transform_4, window_bounds = array<i64: 32, 1>}, {transform_indices = @transform_5, window_bounds = array<i64: 1, 32, 256>}]} {
    %c0 = arith.constant 0 : index
    %c0_0 = arith.constant 0 : index
    %0 = vector.load %arg3[%c0, %c0_0] : memref<8x32xf32, #tpu.memory_space<vmem>>, vector<8x32xf32>
    %c0_1 = arith.constant 0 : index
    %c0_2 = arith.constant 0 : index
    %1 = vector.load %arg4[%c0_1, %c0_2] : memref<8x1xf32, #tpu.memory_space<vmem>>, vector<8x1xf32>
    %c0_3 = arith.constant 0 : index
    %c0_4 = arith.constant 0 : index
    %2 = vector.load %arg5[%c0_3, %c0_4] : memref<32x8xf32, #tpu.memory_space<vmem>>, vector<32x8xf32>
    %c0_5 = arith.constant 0 : index
    %c0_6 = arith.constant 0 : index
    %3 = vector.load %arg6[%c0_5, %c0_6] : memref<32x1xf32, #tpu.memory_space<vmem>>, vector<32x1xf32>
    %c0_7 = arith.constant 0 : index
    %c0_8 = arith.constant 0 : index
    %c0_9 = arith.constant 0 : index
    %4 = vector.load %arg2[%c0_7, %c0_8, %c0_9] : memref<1x32x256xf32, #tpu.memory_space<vmem>>, vector<1x32x256xf32>
    %5 = vector.shape_cast %4 : vector<1x32x256xf32> to vector<32x256xf32>
    %cst = arith.constant dense<0.000000e+00> : vector<8x256xf32>
    %6 = tpu.matmul %0, %5, %cst {dimension_numbers = #tpu.dot_dimension_numbers<[1], [0], [0], [1], [0, 0, 1, 1], [], []>} : vector<8x32xf32>, vector<32x256xf32>, vector<8x256xf32> -> vector<8x256xf32>
    %7 = vector.broadcast %1 : vector<8x1xf32> to vector<8x256xf32>
    %8 = arith.addf %6, %7 : vector<8x256xf32>
    %cst_10 = arith.constant 0.000000e+00 : f32
    %9 = vector.broadcast %cst_10 : f32 to vector<8x256xf32>
    %10 = arith.maximumf %8, %9 : vector<8x256xf32>
    %cst_11 = arith.constant dense<0.000000e+00> : vector<32x256xf32>
    %11 = tpu.matmul %2, %10, %cst_11 {dimension_numbers = #tpu.dot_dimension_numbers<[1], [0], [0], [1], [0, 0, 1, 1], [], []>} : vector<32x8xf32>, vector<8x256xf32>, vector<32x256xf32> -> vector<32x256xf32>
    %12 = vector.broadcast %3 : vector<32x1xf32> to vector<32x256xf32>
    %13 = arith.addf %11, %12 : vector<32x256xf32>
    %cst_12 = arith.constant 0.000000e+00 : f32
    %14 = vector.broadcast %cst_12 : f32 to vector<32x256xf32>
    %15 = arith.subf %14, %13 : vector<32x256xf32>
    %16 = math.exp %15 : vector<32x256xf32>
    %cst_13 = arith.constant 1.000000e+00 : f32
    %17 = vector.broadcast %cst_13 : f32 to vector<32x256xf32>
    %18 = arith.addf %17, %16 : vector<32x256xf32>
    %19 = tpu.reciprocal %18 {approx = true} : vector<32x256xf32> -> vector<32x256xf32>
    %20 = arith.mulf %5, %19 : vector<32x256xf32>
    %c0_14 = arith.constant 0 : index
    %c0_15 = arith.constant 0 : index
    %c0_16 = arith.constant 0 : index
    %21 = vector.load %arg7[%c0_14, %c0_15, %c0_16] : memref<1x32x256xf32, #tpu.memory_space<vmem>>, vector<1x32x256xf32>
    %22 = vector.shape_cast %21 : vector<1x32x256xf32> to vector<32x256xf32>
    %23 = vector.shape_cast %20 : vector<32x256xf32> to vector<1x32x256xf32>
    tpu.vector_store %arg7[%c0_14, %c0_15, %c0_16], %23 {strides = array<i32>} : memref<1x32x256xf32, #tpu.memory_space<vmem>>, vector<1x32x256xf32>,
    return
  }
  func.func @transform_0(%arg0: i32, %arg1: i32) -> (i32, i32, i32) {
    %c0_i32 = arith.constant 0 : i32
    %c0_i32_0 = arith.constant 0 : i32
    return %arg0, %c0_i32, %arg1 : i32, i32, i32
  }
  func.func @transform_1(%arg0: i32, %arg1: i32) -> (i32, i32) {
    %c0_i32 = arith.constant 0 : i32
    %c0_i32_0 = arith.constant 0 : i32
    %c0_i32_1 = arith.constant 0 : i32
    return %c0_i32, %c0_i32_0 : i32, i32
  }
  func.func @transform_2(%arg0: i32, %arg1: i32) -> (i32, i32) {
    %c0_i32 = arith.constant 0 : i32
    %c0_i32_0 = arith.constant 0 : i32
    %c0_i32_1 = arith.constant 0 : i32
    return %c0_i32, %c0_i32_0 : i32, i32
  }
  func.func @transform_3(%arg0: i32, %arg1: i32) -> (i32, i32) {
    %c0_i32 = arith.constant 0 : i32
    %c0_i32_0 = arith.constant 0 : i32
    %c0_i32_1 = arith.constant 0 : i32
    return %c0_i32, %c0_i32_0 : i32, i32
  }
  func.func @transform_4(%arg0: i32, %arg1: i32) -> (i32, i32) {
    %c0_i32 = arith.constant 0 : i32
    %c0_i32_0 = arith.constant 0 : i32
    %c0_i32_1 = arith.constant 0 : i32
    return %c0_i32, %c0_i32_0 : i32, i32
  }
  func.func @transform_5(%arg0: i32, %arg1: i32) -> (i32, i32, i32) {
    %c0_i32 = arith.constant 0 : i32
    %c0_i32_0 = arith.constant 0 : i32
    return %arg0, %c0_i32, %arg1 : i32, i32, i32
  }
}

</mosaic_0001>

<bundles_post_ra>
// kernel: tpu_custom_call.1
= control target key start
LH: loop header
LB: loop body
LE: loop exit
PB: predicated region body
PF: predicated region fallthrough
CT: control target
= control target key end

     0   :  { %10 = vsyncpa [#allocation3], 0  ;;  %s1063_s0 = inlined_call_operand.hbm [shape: f32[2,32,256], index: 0, kind: input, shape index: {}]   ;;  %s1064_s1 = inlined_call_operand.vmem [shape: f32[8,32], index: 1, kind: input, shape index: {}]   ;;  %s1065_s2 = inlined_call_operand.vmem [shape: f32[8,1], index: 2, kind: input, shape index: {}]   ;;  %s1066_s3 = inlined_call_operand.vmem [shape: f32[32,8], index: 3, kind: input, shape index: {}]   ;;  %s1067_s4 = inlined_call_operand.vmem [shape: f32[32,1], index: 4, kind: input, shape index: {}]   ;;  %s1068_s5 = inlined_call_operand.hbm [shape: f32[2,32,256], index: 5, kind: output, shape index: {}]  }
   0x1   :  { %12 = vsyncpa [#allocation3 + $0x1], 0 }
   0x2   :  { %13 = vsyncpa [#allocation4], 0 }
   0x3   :  { %15 = vsyncpa [#allocation4 + $0x1], 0  ;;  %s866_s18 = smov 0   ;;  %s868_s19 = smov 0  }
   0x4   :  { %s870_s20 = smov 0   ;;  %s872_s21 = smov 0  }
   0x5   :  { %s874_s22 = smov 0   ;;  %s876_s23 = smov 0  }
   0x6 LB: > { %s586_s24 = sadd.s32 4294967295, %s829_s23   ;;  %s587_s25 = sadd.s32 4294967294, %s829_s23   ;;  %s829_s23 = sphi %s876_s23, %s21_s23   ;;  %s825_s22 = sphi %s874_s22, %s1077_s22   ;;  %s821_s21 = sphi %s872_s21, %s1076_s21   ;;  %s817_s20 = sphi %s870_s20, %s1075_s20   ;;  %s813_s19 = sphi %s868_s19, %s1074_s19   ;;  %s809_s18 = sphi %s866_s18, %s1073_s18  }
   0x7   : > { %s33_s26 = sadd.s32 1, %s825_s22  ;;  %s42_s27 = sadd.s32 1, %s817_s20 }
   0x8   : > { %p35_p0 = scmp.ge.s32.totalorder %s33_s26, 2  ;;  %p49_p1 = scmp.ne.s32.totalorder %s817_s20, %s813_s19 }
   0x9   : > { %p50_p2 = scmp.eq.s32.totalorder %s829_s23, 0  ;;  %p55_p3 = scmp.ne.s32.totalorder %s813_s19, %s809_s18 }
   0xa   : > { %s1079_s26 = smov (%p35_p0, %s33_s26), 0  ;;  %p56_p5 = scmp.eq.s32.totalorder %s586_s24, 0 }
   0xb   : > { %p907_p4 = por %p50_p2, %p49_p1  ;;  %s37_s29 = ssub.s32 %s825_s22, %s1079_s26 }
   0xc   : > { %p165_p6 = scmp.eq.s32.totalorder %s586_s24, 1  ;;  %p40_p7 = scmp.eq.s32.totalorder %s37_s29, 0 }
   0xd   : > { %p913_p8 = por %p56_p5, %p55_p3  ;;  %p171_p10 = scmp.eq.s32.totalorder %s587_s25, 1 }
   0xe   : > { %p917_p9 = por %p165_p6, %p49_p1  ;;  %p589_p12 = scmp.ge.s32.totalorder %s829_s23, 2 }
   0xf   : > { %s922_s7 = scalar_select %p40_p7, %s817_s20, %s42_s27  }
  0x10   : > { %p924_p11 = por %p171_p10, %p55_p3  ;;  %p627_p13 = scmp.lt.s32.totalorder %s829_s23, 2 }
  0x11   : > { %s203_s9 = sand.u32 1, %s817_s20   ;;  %s611_s11 = sshll.u32 %s825_s22, 6 }
  0x12   : > { %s590_s10 = sshll.u32 %s203_s9, 6  ;;  %s214_s14 = scalar_lea.hbm %s1063_s0, %s611_s11 }
  0x13   : > { %s207_s15 = scalar_lea.vmem [#allocation2], %s590_s10  ;;  %s215_s17 = sshll.u32 %s214_s14, 4  ;;  %s216_s17 = int_to_ptr.hbm [resolvable:$true] %s215_s17 }
  0x14   : > { %s217_s16 = sshll.u32 %s207_s15, 4  ;;  %p620_p0 = pnand %p627_p13, %p907_p4  ;;  %s218_s16 = int_to_ptr.vmem [resolvable:$true] %s217_s16 }
  0x15   : > { %p593_p1 = scmp.ge.s32.totalorder %s829_s23, 1  ;;  %s204_s24 = scalar_lea.sflag [#allocation3], %s203_s9 }
  0x16   : > { %s831_s25 = smov 256   ;;  %s832_s27 = smov 16  }
  0x17   : > { %622 = dma.hbm_to_vmem [thread:$0]  (!%p620_p0), %s216_s17, 1024, %s218_s16, %s204_s24, %s831_s25, %s831_s25, %s832_s27  }
  0x18   : > { %p225_p2 = scmp.lt.s32.totalorder %s829_s23, 3 }
  0x1a   : > { %p226_p3 = pnand %p593_p1, %p225_p2 }
  0x1b   : > { %s940_s29 = sand.u32 (!%p226_p3), 1, %s813_s19  }
  0x1c   : > { %229 = sbr.rel (%p226_p3) target bundleno = 353 (0x161), region = 40  ;;  %s594_s10 = sshll.u32 (!%p226_p3), %s940_s29, 6 }
  0x1d   : > { %s232_s11 = scalar_lea.sflag (!%p226_p3), [#allocation3], %s940_s29  ;;  %s235_s28 = scalar_lea.vmem (!%p226_p3), [#allocation2], %s594_s10 }
  0x21   : > { %800 = dma.done.wait (%p913_p8), %s232_s11, 1024  }
  0x22   : > { %802 = vsyncadd (%p913_p8), %s232_s11, 4294966272  ;;  %v833_v0 = vmov 0   ;;  %v950_v1 = vld [vmem:[%s235_s28 + $0x30] sm:$0xff]  ;;  %v952_v2 = vld [vmem:[%s235_s28 + $0x38] sm:$0xff]  ;;  %vm288_vm0 = vcmask 261120   ;;  %vm354_vm1 = vcmask 64512  }
  0x23   : > { %682 = vset.pattern.permute.xlu0 %v833_v0  ;;  %683 = vset.pattern.permute.xlu1 %v833_v0  ;;  %v954_v3 = vld [vmem:[%s235_s28 + $0x20] sm:$0xff]  ;;  %v958_v4 = vld [vmem:[%s235_s28 + $0x28] sm:$0xff]  ;;  %v960_v5 = vld [vmem:[%s235_s28 + $0x10] sm:$0xff]  ;;  %s1008_s17 = scalar_lea.vmem [#allocation5], %s594_s10  ;;  %s612_s10 = sshll.u32 %s821_s21, 6 }
  0x24   : > { %684 = vset.pattern.permute.xlu2 %v833_v0  ;;  %304 = vmatpush.msra.mxu0 %v950_v1  ;;  %v962_v6 = vld [vmem:[%s235_s28 + $0x18] sm:$0xff]  ;;  %v266_v7 = vld [vmem:[%s1065_s2] sm:$0xff]  ;;  %v971_v9 = vld [vmem:[%s235_s28 + $0x8] sm:$0xff]  ;;  %s495_s27 = scalar_lea.hbm %s1068_s5, %s612_s10  ;;  %s496_s11 = sshll.u32 %s1008_s17, 4  ;;  %s497_s11 = int_to_ptr.vmem [resolvable:$true] %s496_s11 }
  0x25   : > { %324 = vmatpush.msra.mxu1 %v952_v2  ;;  %v969_v8 = vld [vmem:[%s235_s28] sm:$0xff]  ;;  %285 = vperm.xlu0 %682, %v266_v7   ;;  %v272_v12 = vld [vmem:[%s1067_s4 + $0x8] sm:$0xff]  ;;  %v274_v13 = vld [vmem:[%s1067_s4 + $0x18] sm:$0xff]  ;;  %s498_s28 = sshll.u32 %s495_s27, 4  ;;  %s482_s21 = scalar_lea.sflag [#allocation4], %s940_s29  ;;  %s499_s28 = int_to_ptr.hbm [resolvable:$true] %s498_s28 }
  0x26   : > { %305 = vmatpush.msra.mxu0 %v954_v3  ;;  %v265_v10 = vld [vmem:[%s1064_s1] sm:$0xff]  ;;  %341 = vperm.xlu1 %683, %v272_v12   ;;  %v273_v14 = vld [vmem:[%s1067_s4 + $0x10] sm:$0xff]  ;;  %v268_v23 = vld [vmem:[%s1066_s3 + $0x8] sm:$0xff]  ;;  %s761_s30 = sshra.s32 %s499_s28, 4  ;;  %s767_s14 = scalar_lea.hbm %s1068_s5, 128  ;;  %s762_s30 = int_to_ptr.hbm [resolvable:$true] %s761_s30 }
  0x27   : > { %325 = vmatpush.msra.mxu1 %v958_v4  ;;  %v271_v11 = vld [vmem:[%s1067_s4] sm:$0xff]  ;;  %351 = vperm.xlu2 %684, %v274_v13   ;;  %v269_v24 = vld [vmem:[%s1066_s3 + $0x10] sm:$0xff]  ;;  %v270_v25 = vld [vmem:[%s1066_s3 + $0x18] sm:$0xff]  ;;  %s763_s9 = scalar_lea.hbm %s762_s30, 64  ;;  %p768_p7 = scmp.lt.s32.totalorder %s762_s30, %s1068_s5 }
  0x28   : > { %306 = vmatpush.msra.mxu0 %v960_v5  ;;  %v267_v22 = vld [vmem:[%s1066_s3] sm:$0xff]  ;;  %p764_p4 = scmp.ne.s32.totalorder %s762_s30, %s763_s9  ;;  %p769_p8 = scmp.lt.s32.totalorder %s767_s14, %s763_s9 }
  0x29   : > { %326 = vmatpush.msra.mxu1 %v962_v6 }
  0x2a   : > { %307 = vmatpush.msra.mxu0 %v969_v8  ;;  %p765_p5 = pnand %p764_p4, %p917_p9  ;;  %p770_p10 = por %p769_p8, %p768_p7 }
  0x2b   : > { %327 = vmatpush.msra.mxu1 %v971_v9  ;;  %596 = vmatmul.msk.f32.vlgmr.msra.gmra.mxu0 %vm288_vm0, %v265_v10 }
  0x2c   : > { %597 = vmatmul.msk.f32.vlgmr.msra.gmra.mxu1 %vm288_vm0, %v265_v10  ;;  %p766_p6 = pneg %p765_p5 }
  0x2d   : > { %336 = vperm.xlu0 %682, %v271_v11  }
  0x2e   : > { %346 = vperm.xlu1 %683, %v273_v14   ;;  %p771_p13 = pnand %p770_p10, %p766_p6 }
  0x81   : > { %v352_v60 = vpop.permute.xlu2 %351 }
  0x97   : > { %v286_v15 = vpop.permute.xlu0 %285 }
  0x98   : > { %v342_v31 = vpop.permute.xlu1 %341 }
  0x9f   : > { %v337_v26 = vpop.permute.xlu0 %336 }
  0xa0   : > { %v347_v44 = vpop.permute.xlu1 %346 }
  0xa8   : > { %v309_v16 = vpop.f32.mrf.mxu0 }
  0xa9   : > { %v329_v17 = vpop.f32.mrf.mxu1  ;;  %v310_v18 = vadd.f32 %v309_v16, %v286_v15 }
  0xaa   : > { %v330_v19 = vadd.f32 %v329_v17, %v286_v15 }
  0xab   : > { %v332_v20 = vmax.f32 %v310_v18, 0.0 }
  0xac   : > { %v333_v21 = vmax.f32 %v330_v19, 0.0 }
  0xad   : > { %382 = vmatpush.msrb.mxu0 %v332_v20  ;;  %613 = vmatpush.msra.mxu2 %v332_v20 }
  0xae   : > { %411 = vmatpush.msrb.mxu1 %v333_v21  ;;  %614 = vmatpush.msra.mxu3 %v333_v21 }
  0xaf   : > { %598 = vmatmul.msk.f32.vlgmr.msrb.gmra.mxu0 %vm354_vm1, %v267_v22  ;;  %599 = vmatmul.msk.f32.vlgmr.msra.gmra.mxu2 %vm354_vm1, %v268_v23 }
  0xb0   : > { %602 = vmatmul.msk.f32.vlgmr.msrb.gmra.mxu1 %vm354_vm1, %v267_v22  ;;  %603 = vmatmul.msk.f32.vlgmr.msra.gmra.mxu3 %vm354_vm1, %v268_v23 }
  0xb7   : > { %600 = vmatmul.msk.f32.gmra.mxu2 %vm354_vm1, %v269_v24 }
  0xb8   : > { %604 = vmatmul.msk.f32.gmra.mxu3 %vm354_vm1, %v269_v24 }
  0xbf   : > { %601 = vmatmul.msk.f32.gmra.mxu2 %vm354_vm1, %v270_v25 }
  0xc0   : > { %605 = vmatmul.msk.f32.gmra.mxu3 %vm354_vm1, %v270_v25 }
 0x12c   : > { %v384_v27 = vpop.f32.mrf.mxu0 }
 0x12d   : > { %v385_v28 = vadd.f32 %v384_v27, %v337_v26  ;;  %v413_v29 = vpop.f32.mrf.mxu1 }
 0x12e   : > { %v414_v30 = vadd.f32 %v413_v29, %v337_v26 }
 0x12f   : > { %v425_v32 = vsub.f32 0.0, %v385_v28 }
 0x130   : > { %v426_v33 = vsub.f32 0.0, %v414_v30 }
 0x131   : > { %v433_v34 = vmul.f32 1.442695, %v425_v32 }
 0x132   : > { %v435_v35 = vmul.f32 1.442695, %v426_v33  ;;  %v387_v36 = vpop.f32.mrf.mxu2 }
 0x133   : > { %685 = vpow2.f32 %v433_v34  ;;  %v388_v37 = vadd.f32 %v387_v36, %v342_v31  ;;  %v416_v38 = vpop.f32.mrf.mxu3 }
 0x134   : > { %687 = vpow2.f32 %v435_v35  ;;  %v417_v39 = vadd.f32 %v416_v38, %v342_v31 }
 0x135   : > { %v427_v40 = vsub.f32 0.0, %v388_v37 }
 0x136   : > { %v428_v41 = vsub.f32 0.0, %v417_v39 }
 0x137   : > { %v437_v42 = vmul.f32 1.442695, %v427_v40 }
 0x138   : > { %v439_v43 = vmul.f32 1.442695, %v428_v41 }
 0x139   : > { %v686_v45 = vpop.eup %685  ;;  %689 = vpow2.f32 %v437_v42 }
 0x13a   : > { %v688_v46 = vpop.eup %687  ;;  %v449_v47 = vadd.f32 1.0, %v686_v45  ;;  %691 = vpow2.f32 %v439_v43  ;;  %v390_v48 = vpop.f32.mrf.mxu2 }
 0x13b   : > { %v450_v49 = vadd.f32 1.0, %v688_v46  ;;  %v391_v50 = vadd.f32 %v390_v48, %v347_v44  ;;  %v419_v51 = vpop.f32.mrf.mxu3 }
 0x13c   : > { %693 = vrcp.f32 %v449_v47  ;;  %v420_v52 = vadd.f32 %v419_v51, %v347_v44 }
 0x13d   : > { %695 = vrcp.f32 %v450_v49  ;;  %v429_v53 = vsub.f32 0.0, %v391_v50 }
 0x13e   : > { %v430_v54 = vsub.f32 0.0, %v420_v52 }
 0x13f   : > { %v690_v55 = vpop.eup %689  ;;  %v441_v56 = vmul.f32 1.442695, %v429_v53 }
 0x140   : > { %v692_v57 = vpop.eup %691  ;;  %v451_v58 = vadd.f32 1.0, %v690_v55  ;;  %v443_v59 = vmul.f32 1.442695, %v430_v54 }
 0x141   : > { %v452_v61 = vadd.f32 1.0, %v692_v57  ;;  %697 = vpow2.f32 %v441_v56 }
 0x142   : > { %v694_v62 = vpop.eup %693  ;;  %699 = vrcp.f32 %v451_v58  ;;  %v393_v63 = vpop.f32.mrf.mxu2 }
 0x143   : > { %v696_v0 = vpop.eup %695  ;;  %v465_v7 = vmul.f32 %v694_v62, %v969_v8  ;;  %701 = vrcp.f32 %v452_v61  ;;  %v394_v10 = vadd.f32 %v393_v63, %v352_v60  ;;  %v422_v11 = vpop.f32.mrf.mxu3 }
 0x144   : > { %v466_v12 = vmul.f32 %v696_v0, %v971_v9  ;;  %703 = vpow2.f32 %v443_v59  ;;  %v423_v13 = vadd.f32 %v422_v11, %v352_v60 }
 0x145   : > { %473 = vst [vmem:[%s1008_s17] sm:$0xff] %v465_v7  ;;  %v431_v14 = vsub.f32 0.0, %v394_v10 }
 0x146   : > { %474 = vst [vmem:[%s1008_s17 + $0x8] sm:$0xff] %v466_v12  ;;  %v432_v15 = vsub.f32 0.0, %v423_v13 }
 0x147   : > { %v698_v16 = vpop.eup %697  ;;  %v445_v8 = vmul.f32 1.442695, %v431_v14 }
 0x148   : > { %v700_v17 = vpop.eup %699  ;;  %v453_v18 = vadd.f32 1.0, %v698_v16  ;;  %v447_v19 = vmul.f32 1.442695, %v432_v15 }
 0x149   : > { %v702_v20 = vpop.eup %701  ;;  %v467_v9 = vmul.f32 %v700_v17, %v960_v5  ;;  %705 = vpow2.f32 %v445_v8 }
 0x14a   : > { %v704_v21 = vpop.eup %703  ;;  %v468_v22 = vmul.f32 %v702_v20, %v962_v6  ;;  %707 = vrcp.f32 %v453_v18 }
 0x14b   : > { %475 = vst [vmem:[%s1008_s17 + $0x10] sm:$0xff] %v467_v9  ;;  %v454_v23 = vadd.f32 1.0, %v704_v21  ;;  %709 = vpow2.f32 %v447_v19 }
 0x14c   : > { %476 = vst [vmem:[%s1008_s17 + $0x18] sm:$0xff] %v468_v22 }
 0x14d   : > { %711 = vrcp.f32 %v454_v23 }
 0x14f   : > { %v706_v24 = vpop.eup %705 }
 0x150   : > { %v708_v25 = vpop.eup %707  ;;  %v455_v26 = vadd.f32 1.0, %v706_v24 }
 0x151   : > { %v710_v27 = vpop.eup %709  ;;  %v469_v28 = vmul.f32 %v708_v25, %v954_v3 }
 0x152   : > { %713 = vrcp.f32 %v455_v26  ;;  %v456_v5 = vadd.f32 1.0, %v710_v27 }
 0x153   : > { %v712_v6 = vpop.eup %711  ;;  %477 = vst [vmem:[%s1008_s17 + $0x20] sm:$0xff] %v469_v28 }
 0x154   : > { %v470_v29 = vmul.f32 %v712_v6, %v958_v4  ;;  %715 = vrcp.f32 %v456_v5 }
 0x156   : > { %478 = vst [vmem:[%s1008_s17 + $0x28] sm:$0xff] %v470_v29 }
 0x158   : > { %v714_v3 = vpop.eup %713 }
 0x159   : > { %v471_v30 = vmul.f32 %v714_v3, %v950_v1 }
 0x15a   : > { %v716_v31 = vpop.eup %715 }
 0x15b   : > { %479 = vst [vmem:[%s1008_s17 + $0x30] sm:$0xff] %v471_v30  ;;  %v472_v32 = vmul.f32 %v716_v31, %v952_v2 }
 0x15d   : > { %480 = vst [vmem:[%s1008_s17 + $0x38] sm:$0xff] %v472_v32 }
 0x15e   : > { %774 = shalt.err (!%p771_p13)
}
 0x15f   : > { %s834_s29 = smov 256   ;;  %s835_s17 = smov 16  }
 0x160   : > { %617 = dma.vmem_to_hbm [thread:$0]  (%p917_p9), %s497_s11, 1024, %s499_s28, %s482_s21, %s834_s29, %s834_s29, %s835_s17  }
 0x161 PF: > { %s513_s10 = sand.u32 1, %s809_s18   ;;  %p624_p0 = pnand %p589_p12, %p924_p11 }
 0x162   : > { %s514_s24 = scalar_lea.sflag [#allocation4], %s513_s10 }
 0x163   : > { %p625_p1 = pneg %p624_p0 }
 0x165   : > { %804 = dma.done.wait (%p625_p1), %s514_s24, 1024  }
 0x166   : > { %806 = vsyncadd (%p625_p1), %s514_s24, 4294966272  ;;  %s21_s23 = sadd.s32 1, %s829_s23   ;;  %s1073_s18 = smov %s813_s19 }
 0x167   : > { %p18_p2 = scmp.ge.s32.totalorder %s21_s23, 4   ;;  %s1074_s19 = smov %s817_s20 }
 0x168   : > { %s1075_s20 = smov %s922_s7  ;;  %s1076_s21 = smov %s825_s22 }
 0x169   : > { %s1077_s22 = smov %s1079_s26  ;;  %20 = sbr.rel (!%p18_p2) target bundleno = 6 (0x6), region = 85 }
 0x16e   :  { %520 = vsyncpa [#allocation3], 1 }
 0x16f   :  { %522 = vsyncpa [#allocation3 + $0x1], 1 }
 0x170   :  { %523 = vsyncpa [#allocation4], 1 }
 0x171   :  { %525 = vsyncpa [#allocation4 + $0x1], 1 }

</bundles_post_ra>
